<compile_context>
chip_gen: v5e
topology: v5e:2x2
jax: 0.10.0
libtpu: 0.0.40
codegen_flags: <defaults>
</compile_context>

<pallas_src>
import math

import jax
import jax.numpy as jnp
from jax.experimental import pallas as pl
from jax.experimental.pallas import tpu as pltpu


# ----------------------------------------------------------------------------
# pltpu.roll direction probe (tiny one-off kernel).  Guarantees the width-tap
# shifts match the jnp.roll convention regardless of the lowering's sign.
# ----------------------------------------------------------------------------
_ROLL_MOVES_DOWN = None


def _probe_roll_kernel(x_ref, o_ref):
    o_ref[...] = pltpu.roll(x_ref[...], shift=1, axis=0)


def _roll_moves_down():
    """True iff pltpu.roll(x, 1, axis=0)[r] == x[r-1] (jnp.roll convention)."""
    global _ROLL_MOVES_DOWN
    if _ROLL_MOVES_DOWN is None:
        x = jnp.arange(8 * 128, dtype=jnp.float32).reshape(8, 128)
        y = pl.pallas_call(
            _probe_roll_kernel,
            out_shape=jax.ShapeDtypeStruct((8, 128), jnp.float32))(x)
        if bool(jnp.array_equal(y, jnp.roll(x, 1, axis=0))):
            _ROLL_MOVES_DOWN = True
        elif bool(jnp.array_equal(y, jnp.roll(x, -1, axis=0))):
            _ROLL_MOVES_DOWN = False
        else:
            raise AssertionError("unexpected pltpu.roll semantics")
    return _ROLL_MOVES_DOWN


# ----------------------------------------------------------------------------
# Fused kernel for one block of BLK = nb*W rows.
#   A[n*W + w, c*H + h] = act[n, c, h, w]
#   conv(pad=(0,1), valid height) == [A(w-1) | A(w) | A(w+1)] @ W_stacked + b
# ----------------------------------------------------------------------------
def _make_kernel(w_dim, f_out, shift_left, shift_right):
    def kernel(x_ref, w1_ref, b1_ref, w2_ref, b2_ref, w3t_ref, b3_ref,
               out_ref):
        blk = x_ref.shape[0]

        # Width-boundary masks (computed once, reused by all three layers).
        r = jax.lax.broadcasted_iota(jnp.int32, (blk, 1), 0)
        has_left = (r % w_dim) != 0                   # a valid w-1 neighbour
        has_right = (r % w_dim) != (w_dim - 1)        # a valid w+1 neighbour

        def width_taps(a):
            # +-1 sublane shift on the XLU + VPU mask instead of BLKxBLK
            # shift matmuls; zero rows reproduce the width zero-padding.
            a_l = jnp.where(has_left,
                            pltpu.roll(a, shift=shift_left, axis=0), 0.0)
            a_r = jnp.where(has_right,
                            pltpu.roll(a, shift=shift_right, axis=0), 0.0)
            return jnp.concatenate([a_l, a, a_r], axis=-1)

        a0 = x_ref[...]                                       # (blk, H0) f32

        # Layer 1 (MXU, bf16 operands, f32 accumulation).
        c1 = width_taps(a0).astype(jnp.bfloat16)              # (blk, 3*H0)
        a1 = jnp.dot(c1, w1_ref[...],
                     preferred_element_type=jnp.float32) + b1_ref[...]
        a1 = jnp.maximum(a1, 0.0)                             # (blk, F1)

        # Layer 2 (MXU, bf16 operands, f32 accumulation).
        c2 = width_taps(a1).astype(jnp.bfloat16)              # (blk, 3*F1)
        a2 = jnp.dot(c2, w2_ref[...],
                     preferred_element_type=jnp.float32) + b2_ref[...]
        a2 = jnp.maximum(a2, 0.0)                             # (blk, F2)

        # Layer 3: f_out (= c3*h3) is tiny -> VPU multiply + lane reduction
        # instead of a skinny N=f_out MXU matmul.
        c3 = width_taps(a2)                                   # (blk, 3*F2) f32
        w3t = w3t_ref[...]                                    # (f_out, 3*F2)
        b3 = b3_ref[...]                                      # (1, f_out)
        cols = [jnp.sum(c3 * w3t[fo:fo + 1, :], axis=-1, keepdims=True)
                + b3[:, fo:fo + 1]
                for fo in range(f_out)]
        a3 = cols[0] if f_out == 1 else jnp.concatenate(cols, axis=-1)
        out_ref[...] = a3.astype(out_ref.dtype)

    return kernel


# ----------------------------------------------------------------------------
# Wrapper-side weight preprocessing (trace-time only)
# ----------------------------------------------------------------------------
def _make_block_weights(k, h_in):
    """k: (C_out, C_in, KH, KW) -> per-kw block matrices.

    M_kw[ci*H_in + hi, co*H_out + ho] = k[co, ci, hi-ho, kw] (0 <= hi-ho < KH).
    """
    c_out, c_in, kh_sz, kw_sz = k.shape
    h_out = h_in - kh_sz + 1
    mats = []
    for kw in range(kw_sz):
        m = jnp.zeros((c_in * h_in, c_out * h_out), jnp.float32)
        for kh in range(kh_sz):
            blk = k[:, :, kh, kw].T.astype(jnp.float32)        # (C_in, C_out)
            for ho in range(h_out):
                hi = ho + kh
                m = m.at[hi::h_in, ho::h_out].set(blk)
        mats.append(m)
    return mats


def cnn_forward(x, params, cw_size, *, target_block_rows=1024):
    """x: (steps, batch, cw_size*W) -> (steps, batch, C_out*H_out*W)."""
    steps, batch, d = x.shape
    assert d % cw_size == 0
    w_dim = d // cw_size
    n = steps * batch

    k1, b1 = params["conv1"]
    k2, b2 = params["conv2"]
    k3, b3 = params["conv3"]

    h0 = cw_size
    h1 = h0 - (k1.shape[2] - 1)
    h2 = h1 - (k2.shape[2] - 1)
    h3 = h2 - (k3.shape[2] - 1)
    c3 = k3.shape[0]
    assert h3 >= 1, "cw_size too small for three valid-height 3x3 convs"
    f_out = c3 * h3

    # (steps, batch, H0*W) -> (N*W, H0): row = (sample, width).
    a0 = (x.reshape(n, h0, w_dim).transpose(0, 2, 1)
           .reshape(n * w_dim, h0).astype(jnp.float32))

    rows = n * w_dim
    # Block rows: multiple of lcm(W, 8), ~target_block_rows, but keep >= 2
    # grid blocks so v7x's two TensorCores both get work.
    unit = (w_dim * 8) // math.gcd(w_dim, 8)
    max_units = max(1, min(target_block_rows // unit if unit <= target_block_rows else 1,
                           ((rows + unit - 1) // unit) // 2))
    blk = unit * max_units
    rows_pad = ((rows + blk - 1) // blk) * blk
    if rows_pad != rows:
        a0 = jnp.concatenate(
            [a0, jnp.zeros((rows_pad - rows, h0), jnp.float32)], axis=0)
    num_blocks = rows_pad // blk

    # Stacked weights: rows = [left | center | right] width taps (bf16 for the
    # MXU layers, f32 transposed row-vector(s) for the VPU last layer).
    # (On v5e the N=160/96 outputs split into 128+remainder MXU tiles; padding
    #  would not reduce tile count, so the natural (c,h) ordering is kept.)
    w1s = jnp.concatenate(_make_block_weights(k1, h0), axis=0).astype(jnp.bfloat16)
    w2s = jnp.concatenate(_make_block_weights(k2, h1), axis=0).astype(jnp.bfloat16)
    w3t = jnp.concatenate(_make_block_weights(k3, h2), axis=0).T      # (f_out, 3*F2) f32
    bb1 = jnp.repeat(b1.astype(jnp.float32), h1).reshape(1, -1)
    bb2 = jnp.repeat(b2.astype(jnp.float32), h2).reshape(1, -1)
    bb3 = jnp.repeat(b3.astype(jnp.float32), h3).reshape(1, -1)

    f0 = 1 * h0
    f1 = k1.shape[0] * h1
    f2 = k2.shape[0] * h2

    if _roll_moves_down():
        s_left, s_right = 1, blk - 1          # roll(a, 1)[r] == a[r-1]
    else:
        s_left, s_right = blk - 1, 1

    kernel = _make_kernel(w_dim, f_out, s_left, s_right)

    const = lambda i: (0, 0)
    out = pl.pallas_call(
        kernel,
        out_shape=jax.ShapeDtypeStruct((rows_pad, f_out), jnp.float32),
        grid=(num_blocks,),
        in_specs=[
            pl.BlockSpec((blk, f0), lambda i: (i, 0)),
            pl.BlockSpec((3 * f0, f1), const),
            pl.BlockSpec((1, f1), const),
            pl.BlockSpec((3 * f1, f2), const),
            pl.BlockSpec((1, f2), const),
            pl.BlockSpec((f_out, 3 * f2), const),
            pl.BlockSpec((1, f_out), const),
        ],
        out_specs=pl.BlockSpec((blk, f_out), lambda i: (i, 0)),
        compiler_params=pltpu.CompilerParams(
            dimension_semantics=("parallel",)),
    )(a0, w1s, bb1, w2s, bb2, w3t, bb3)

    out = out[:rows]
    # rows layout (n, w), features (co, ho) -> PyTorch flatten order (co, ho, w)
    out = out.reshape(n, w_dim, f_out).transpose(0, 2, 1)
    return out.reshape(steps, batch, -1)


# ----------------------------------------------------------------------------
# Pure-JAX reference (independent of the block-matrix math above)
# ----------------------------------------------------------------------------
def cnn_forward_ref(x, params, cw_size):
    steps, batch, d = x.shape
    w_dim = d // cw_size
    xi = x.reshape(steps * batch, 1, cw_size, w_dim)

    def conv(a, k, b):
        y = jax.lax.conv_general_dilated(
            a, k, window_strides=(1, 1), padding=((0, 0), (1, 1)),
            dimension_numbers=("NCHW", "OIHW", "NCHW"))
        return y + b.reshape(1, -1, 1, 1)

    k1, b1 = params["conv1"]
    k2, b2 = params["conv2"]
    k3, b3 = params["conv3"]
    y = jnp.maximum(conv(xi, k1, b1), 0.0)
    y = jnp.maximum(conv(y, k2, b2), 0.0)
    y = conv(y, k3, b3)
    return y.reshape(steps, batch, -1)


def init_params(key, filter_size=3, channels=32):
    def conv_init(k, c_out, c_in, ks):
        kw, kb = jax.random.split(k)
        s = 1.0 / jnp.sqrt(c_in * ks * ks)
        w = jax.random.uniform(kw, (c_out, c_in, ks, ks), jnp.float32, -s, s)
        b = jax.random.uniform(kb, (c_out,), jnp.float32, -s, s)
        return w, b

    _, ka, kb, kc = jax.random.split(key, 4)
    return {
        "conv1": conv_init(ka, channels, 1, filter_size),
        "conv2": conv_init(kb, channels, channels, filter_size),
        "conv3": conv_init(kc, 1, channels, filter_size),
    }


if __name__ == "__main__":
    # options: cw_left=3, cw_right=3 -> cw_size=7; cnn_filter_size=3; 32 ch.
    cw_left, cw_right = 3, 3
    cw_size = cw_left + cw_right + 1          # 7
    filter_size = 3
    channels = 32
    steps, batch, feat_w = 8, 4, 16           # x: (8, 4, 7*16=112)

    key = jax.random.PRNGKey(0)
    key, kx, kp = jax.random.split(key, 3)
    x = jax.random.normal(kx, (steps, batch, cw_size * feat_w), jnp.float32)
    params = init_params(kp, filter_size, channels)

    out = cnn_forward(x, params, cw_size)
    jax.block_until_ready(out)

    out_ref = cnn_forward_ref(x, params, cw_size)
    assert out.shape == out_ref.shape, (out.shape, out_ref.shape)
    # Tolerance sized for bf16 MXU operands (layers 1-2); reference is f32.
    assert jnp.allclose(out, out_ref, rtol=2e-2, atol=2e-2), \
        float(jnp.max(jnp.abs(out - out_ref)))

    print("KERNEL_OK")
</pallas_src>

<mosaic_0001>
module attributes {stable_mosaic.version = 11 : i64} {
  func.func @_probe_roll_kernel(%arg0: memref<8x128xf32, #tpu.memory_space<vmem>>, %arg1: memref<8x128xf32, #tpu.memory_space<vmem>>) attributes {dimension_semantics = [], scalar_prefetch = 0 : i64, scratch_operands = 0 : i64, tpu.core_type = #tpu.core_type<tc>} {
    %c0 = arith.constant 0 : index
    %c0_0 = arith.constant 0 : index
    %0 = vector.load %arg0[%c0, %c0_0] : memref<8x128xf32, #tpu.memory_space<vmem>>, vector<8x128xf32>
    %c1_i32 = arith.constant 1 : i32
    %1 = tpu.dynamic_rotate %0 by %c1_i32 dim 0 : vector<8x128xf32>, i32 -> vector<8x128xf32>
    %c0_1 = arith.constant 0 : index
    %c0_2 = arith.constant 0 : index
    %2 = vector.load %arg1[%c0_1, %c0_2] : memref<8x128xf32, #tpu.memory_space<vmem>>, vector<8x128xf32>
    tpu.vector_store %arg1[%c0_1, %c0_2], %1 {strides = array<i32>} : memref<8x128xf32, #tpu.memory_space<vmem>>, vector<8x128xf32>,
    return
  }
}

</mosaic_0001>

<bundles_post_ra>
// kernel: tpu_custom_call.1
= control target key start
LH: loop header
LB: loop body
LE: loop exit
PB: predicated region body
PF: predicated region fallthrough
CT: control target
= control target key end

     0   :  { %6 = vsyncpa [#allocation3], 0  ;;  %s115_s0 = inlined_call_operand.hbm [shape: f32[8,128], index: 0, kind: input, shape index: {}]   ;;  %s116_s1 = inlined_call_operand.hbm [shape: f32[8,128], index: 1, kind: output, shape index: {}]  }
   0x1   :  { %7 = vsyncpa [#allocation4], 0  ;;  %s13_s8 = sshll.u32 %s115_s0, 4  ;;  %s97_s9 = smov [#allocation2]   ;;  %s14_s8 = int_to_ptr.hbm [resolvable:$true] %s13_s8 }
   0x2   :  { %s15_s10 = sshll.u32 %s97_s9, 4  ;;  %s16_s10 = int_to_ptr.vmem [resolvable:$true] %s15_s10 }
   0x3   :  { %18 = dma.hbm_to_vmem [thread:$0]  %s14_s8, 128, %s16_s10, [#allocation3]  }
   0x4   :  { %93 = dma.done.wait [#allocation3], 128  }
   0x5   :  { %94 = vsyncadd [#allocation3], 4294967168  ;;  %s98_s11 = smov [#allocation5]   ;;  %s33_s15 = sshll.u32 %s116_s1, 4  ;;  %v23_v0 = vld [vmem:[#allocation2] sm:$0xff]  ;;  %s34_s15 = int_to_ptr.hbm [resolvable:$true] %s33_s15 }
   0x6   :  { %s31_s12 = sshll.u32 %s98_s11, 4  ;;  %v24_v1 = vrot.slane %v23_v0, 7  ;;  %s32_s12 = int_to_ptr.vmem [resolvable:$true] %s31_s12 }
   0x8   :  { %25 = vst [vmem:[#allocation5] sm:$0xff] %v24_v1 }
   0x9   :  { %36 = dma.vmem_to_hbm [thread:$0]  %s32_s12, 128, %s34_s15, [#allocation4]  }
   0xa   :  { %95 = dma.done.wait [#allocation4], 128  }
   0xb   :  { %96 = vsyncadd [#allocation4], 4294967168 }
   0xc   :  { %41 = vsyncpa [#allocation3], 1 }
   0xd   :  { %42 = vsyncpa [#allocation4], 1 }

</bundles_post_ra>
